<compile_context>
chip_gen: v7x
topology: tpu7x:2x2x1
jax: 0.10.0
libtpu: 0.0.40
codegen_flags: <defaults>
</compile_context>

<pallas_src>
import math
import functools

import jax
import jax.numpy as jnp
from jax.experimental import pallas as pl
from jax.experimental.pallas import tpu as pltpu

NEG_SLOPE = 0.2                   # nn.LeakyReLU(0.2)
EPS = 1e-5                        # nn.InstanceNorm2d eps (affine=True, biased var)
INV_SQRT2 = 1.0 / math.sqrt(2.0)
_PREC = jax.lax.Precision.HIGHEST  # reference only
_PARALLEL = pltpu.CompilerParams(dimension_semantics=("parallel",))


def _leaky(x):
    return jnp.where(x >= 0, x, NEG_SLOPE * x)


def _instance_norm(x, g, b):
    # x: (C, HW) f32, stats over the spatial (lane) axis; g, b: (C, 1).
    m = jnp.mean(x, axis=1, keepdims=True)
    v = jnp.mean((x - m) ** 2, axis=1, keepdims=True)
    sc = g * jax.lax.rsqrt(v + EPS)
    return x * sc + (b - sc * m)


def _conv3x3(a, w_ref, b_ref, mask_ref, slab_ref, Ww):
    """3x3 'same' conv (zero pad) on a flat (Cin, H*W) activation.

    Builds the 9 shifted taps (static lane shifts + row-edge masks), stages
    them as a (9*Cin, HW) slab in VMEM and does ONE bf16 matmul against the
    packed weight (Cout, 9*Cin).  Returns (Cout, HW) f32 (bias added)."""
    cin, hw = a.shape
    mask_l = mask_ref[0:1, :]          # 0 where w == 0      (used for ox = -1)
    mask_r = mask_ref[1:2, :]          # 0 where w == Ww - 1 (used for ox = +1)
    k = 0
    for oy in (-1, 0, 1):              # row-block order (dy, dx, cin) matches
        for ox in (-1, 0, 1):          # the packed weight column order
            d = oy * Ww + ox           # tap[i] = a[i + d] (zero outside image)
            if d > 0:
                t = jnp.concatenate(
                    [a[:, d:], jnp.zeros((cin, d), a.dtype)], axis=1)
            elif d < 0:
                t = jnp.concatenate(
                    [jnp.zeros((cin, -d), a.dtype), a[:, :hw + d]], axis=1)
            else:
                t = a
            if ox == -1:
                t = t * mask_l
            elif ox == 1:
                t = t * mask_r
            slab_ref[pl.ds(k * cin, cin), pl.ds(0, hw)] = t
            k += 1
    slab = slab_ref[:, pl.ds(0, hw)].astype(jnp.bfloat16)        # (9*Cin, HW)
    return jnp.dot(w_ref[...], slab,
                   preferred_element_type=jnp.float32) + b_ref[...]


# ------------------------------ fused kernel ----------------------------------

def _resblk_kernel(*refs, normalize, learned_sc, downsample, H, W):
    it = iter(refs)
    x_ref = next(it)                                   # (1, Cin, H*W) f32
    if normalize:
        g1_ref = next(it); be1_ref = next(it)          # (Cin, 1) f32
        g2_ref = next(it); be2_ref = next(it)          # (Cin, 1) f32
    w1_ref = next(it)                                  # (Cin, 9*Cin)  bf16
    b1_ref = next(it)                                  # (Cin, 1)      f32
    w2_ref = next(it)                                  # (Cout, 9*Cin) bf16
    b2_ref = next(it)                                  # (Cout, 1)     f32
    scw_ref = next(it) if learned_sc else None         # (Cout, Cin)   bf16
    m1_ref = next(it)                                  # (2, H*W)   row-edge masks
    m2_ref = next(it)                                  # (2, Ho*Wo) row-edge masks
    p_ref = next(it) if downsample else None           # (H*W, Ho*Wo) pool matrix
    o_ref = next(it)                                   # out: (1, Cout, Ho*Wo) f32
    slab_ref = next(it)                                # VMEM (9*Cin, H*W) f32

    cin = x_ref.shape[1]
    hw = H * W
    Wo = W // 2 if downsample else W

    xf = x_ref[...].reshape(cin, hw)                   # f32, spatial on lanes

    # ---- shortcut: pool first (exact: pool and 1x1 conv commute), then 1x1 ----
    s = xf
    if downsample:
        s = jnp.dot(s, p_ref[...], preferred_element_type=jnp.float32)
    if learned_sc:
        s = jnp.dot(scw_ref[...], s.astype(jnp.bfloat16),
                    preferred_element_type=jnp.float32)           # (Cout, Ho*Wo)

    # ---- residual: IN1 + leaky -> conv1 (single K = 9*Cin matmul) ----
    a = xf
    if normalize:
        a = _instance_norm(a, g1_ref[...], be1_ref[...])
    a = _leaky(a)
    r = _conv3x3(a, w1_ref, b1_ref, m1_ref, slab_ref, W)          # (Cin, H*W)

    # ---- avg_pool2d(2): exact matmul with the 0.25 one-hot pooling matrix ----
    if downsample:
        r = jnp.dot(r, p_ref[...], preferred_element_type=jnp.float32)

    # ---- IN2 + leaky -> conv2 ----
    a2 = r
    if normalize:
        a2 = _instance_norm(a2, g2_ref[...], be2_ref[...])
    a2 = _leaky(a2)
    out = _conv3x3(a2, w2_ref, b2_ref, m2_ref, slab_ref, Wo)      # (Cout, Ho*Wo)

    o_ref[...] = ((out + s) * INV_SQRT2).reshape(o_ref.shape).astype(o_ref.dtype)


# ---------------------------- wrapper / pallas_call ----------------------------

def _row_masks(Hh, Ww):
    """(2, Hh*Ww) f32: row 0 zeroes column w==0 (dx=-1 taps), row 1 zeroes w==Ww-1."""
    w_idx = jnp.arange(Hh * Ww, dtype=jnp.int32) % Ww
    return jnp.stack([(w_idx != 0).astype(jnp.float32),
                      (w_idx != Ww - 1).astype(jnp.float32)], axis=0)


def _pool_matrix(Hh, Ww):
    """(Hh*Ww, Ho*Wo) f32 matrix so that  x_flat @ P  == avg_pool2d(x, 2) flat."""
    Ho, Wo = Hh // 2, Ww // 2
    rows = jnp.arange(Hh * Ww, dtype=jnp.int32)
    col = (rows // Ww // 2) * Wo + (rows % Ww) // 2
    return 0.25 * jax.nn.one_hot(col, Ho * Wo, dtype=jnp.float32)


def resblk_forward(x_nchw, kp, *, normalize, downsample):
    """Exact ResBlk.forward semantics: (shortcut(x) + residual(x)) / sqrt(2).
    Takes / returns NCHW float32; only free reshapes happen outside the kernel."""
    N, Cin, H, W = x_nchw.shape
    learned_sc = kp["sc_w"] is not None
    Cout = kp["w2"].shape[0]
    if downsample:
        assert H % 2 == 0 and W % 2 == 0, "avg_pool2d(2) path assumes even H, W"
    Ho, Wo = (H // 2, W // 2) if downsample else (H, W)

    x_flat = x_nchw.reshape(N, Cin, H * W).astype(jnp.float32)

    args = [x_flat]
    in_specs = [pl.BlockSpec((1, Cin, H * W), lambda n: (n, 0, 0))]

    def add_const(arr):
        args.append(arr)
        nd = arr.ndim
        in_specs.append(pl.BlockSpec(arr.shape, lambda n, _nd=nd: (0,) * _nd))

    if normalize:
        for k in ("norm1_g", "norm1_b", "norm2_g", "norm2_b"):
            add_const(kp[k])
    add_const(kp["w1"]); add_const(kp["b1"])
    add_const(kp["w2"]); add_const(kp["b2"])
    if learned_sc:
        add_const(kp["sc_w"])
    add_const(_row_masks(H, W))
    add_const(_row_masks(Ho, Wo))
    if downsample:
        add_const(_pool_matrix(H, W))

    kernel = functools.partial(_resblk_kernel, normalize=normalize,
                               learned_sc=learned_sc, downsample=downsample,
                               H=H, W=W)
    out = pl.pallas_call(
        kernel,
        out_shape=jax.ShapeDtypeStruct((N, Cout, Ho * Wo), jnp.float32),
        grid=(N,),
        in_specs=in_specs,
        out_specs=pl.BlockSpec((1, Cout, Ho * Wo), lambda n: (n, 0, 0)),
        scratch_shapes=[pltpu.VMEM((9 * Cin, H * W), jnp.float32)],
        compiler_params=_PARALLEL,
    )(*args)
    return out.reshape(N, Cout, Ho, Wo)


# --------------------------- parameters (f32, torch-like) ----------------------
# Conv weights are HWIO (PyTorch OIHW weights would be transposed (2,3,1,0)).

def make_params(key, dim_in, dim_out, *, normalize):
    ks = jax.random.split(key, 8)
    p = {
        "conv1_w": 0.1 * jax.random.normal(ks[0], (3, 3, dim_in, dim_in), jnp.float32),
        "conv1_b": 0.05 * jax.random.normal(ks[1], (1, dim_in), jnp.float32),
        "conv2_w": 0.1 * jax.random.normal(ks[2], (3, 3, dim_in, dim_out), jnp.float32),
        "conv2_b": 0.05 * jax.random.normal(ks[3], (1, dim_out), jnp.float32),
        "norm1_g": None, "norm1_b": None, "norm2_g": None, "norm2_b": None,
        "sc_w": None,
    }
    if normalize:
        p["norm1_g"] = 1.0 + 0.1 * jax.random.normal(ks[4], (1, dim_in), jnp.float32)
        p["norm1_b"] = 0.1 * jax.random.normal(ks[5], (1, dim_in), jnp.float32)
        p["norm2_g"] = 1.0 + 0.1 * jax.random.normal(ks[6], (1, dim_in), jnp.float32)
        p["norm2_b"] = 0.1 * jax.random.normal(ks[7], (1, dim_in), jnp.float32)
    if dim_in != dim_out:                                    # learned shortcut
        p["sc_w"] = 0.1 * jax.random.normal(jax.random.fold_in(key, 99),
                                            (dim_in, dim_out), jnp.float32)
    return p


def prepare_kernel_params(p):
    """One-time packing: bf16 matmul-layout weights, (C,1) biases / norm params."""
    cin = p["conv1_w"].shape[2]
    cout = p["conv2_w"].shape[3]
    kp = {
        "w1": jnp.transpose(p["conv1_w"], (3, 0, 1, 2)).reshape(cin, 9 * cin)
                 .astype(jnp.bfloat16),
        "b1": p["conv1_b"].reshape(cin, 1),
        "w2": jnp.transpose(p["conv2_w"], (3, 0, 1, 2)).reshape(cout, 9 * cin)
                 .astype(jnp.bfloat16),
        "b2": p["conv2_b"].reshape(cout, 1),
        "sc_w": None if p["sc_w"] is None
                else jnp.transpose(p["sc_w"]).astype(jnp.bfloat16),   # (Cout, Cin)
    }
    for k in ("norm1_g", "norm1_b", "norm2_g", "norm2_b"):
        kp[k] = None if p[k] is None else p[k].reshape(-1, 1)
    return kp


# --------------------------- pure-JAX f32 reference ----------------------------

def _ref_forward(x_nchw, p, *, normalize, downsample):
    x = jnp.transpose(x_nchw, (0, 2, 3, 1))

    def conv(x, w, b):
        y = jax.lax.conv_general_dilated(
            x, w, (1, 1), [(1, 1), (1, 1)],
            dimension_numbers=("NHWC", "HWIO", "NHWC"), precision=_PREC)
        return y + b.reshape(1, 1, 1, -1)

    def inorm(x, g, b):
        m = x.mean((1, 2), keepdims=True)
        v = ((x - m) ** 2).mean((1, 2), keepdims=True)
        return ((x - m) * jax.lax.rsqrt(v + EPS)) * g.reshape(1, 1, 1, -1) + b.reshape(1, 1, 1, -1)

    def pool(x):
        N, H, W, C = x.shape
        return x.reshape(N, H // 2, 2, W // 2, 2, C).mean((2, 4))

    s = x
    if p["sc_w"] is not None:
        s = jnp.einsum("nhwc,cf->nhwf", s, p["sc_w"], precision=_PREC)
    if downsample:
        s = pool(s)
    r = x
    if normalize:
        r = inorm(r, p["norm1_g"], p["norm1_b"])
    r = conv(_leaky(r), p["conv1_w"], p["conv1_b"])
    if downsample:
        r = pool(r)
    if normalize:
        r = inorm(r, p["norm2_g"], p["norm2_b"])
    r = conv(_leaky(r), p["conv2_w"], p["conv2_b"])
    out = (s + r) * INV_SQRT2
    return jnp.transpose(out, (0, 3, 1, 2))


# ----------------------------------- main --------------------------------------

if __name__ == "__main__":
    key = jax.random.PRNGKey(0)
    kx, kp1, kp2 = jax.random.split(key, 3)
    N, Cin, H, W = 2, 4, 16, 16
    x = jax.random.normal(kx, (N, Cin, H, W), jnp.float32)

    configs = [
        dict(dim_out=8, normalize=True, downsample=True),    # learned_sc + norm + pool
        dict(dim_out=4, normalize=False, downsample=False),  # identity shortcut path
    ]
    for cfg, pk in zip(configs, (kp1, kp2)):
        p = make_params(pk, Cin, cfg["dim_out"], normalize=cfg["normalize"])
        kp = prepare_kernel_params(p)
        out = resblk_forward(x, kp, normalize=cfg["normalize"],
                             downsample=cfg["downsample"])
        out = jax.block_until_ready(out)
        ref = _ref_forward(x, p, normalize=cfg["normalize"],
                           downsample=cfg["downsample"])
        assert out.shape == ref.shape, (out.shape, ref.shape)
        # tolerance accounts for bf16-in / f32-acc MXU convs vs f32-HIGHEST reference
        err = float(jnp.max(jnp.abs(out - ref)))
        assert bool(jnp.allclose(out, ref, rtol=2e-2, atol=2e-2)), err

    print("KERNEL_OK")
</pallas_src>

<mosaic_0001>
module attributes {stable_mosaic.version = 11 : i64} {
  func.func @_resblk_kernel(%arg0: i32, %arg1: memref<1x4x256xf32, #tpu.memory_space<vmem>>, %arg2: memref<4x1xf32, #tpu.memory_space<vmem>>, %arg3: memref<4x1xf32, #tpu.memory_space<vmem>>, %arg4: memref<4x1xf32, #tpu.memory_space<vmem>>, %arg5: memref<4x1xf32, #tpu.memory_space<vmem>>, %arg6: memref<4x36xbf16, #tpu.memory_space<vmem>>, %arg7: memref<4x1xf32, #tpu.memory_space<vmem>>, %arg8: memref<8x36xbf16, #tpu.memory_space<vmem>>, %arg9: memref<8x1xf32, #tpu.memory_space<vmem>>, %arg10: memref<8x4xbf16, #tpu.memory_space<vmem>>, %arg11: memref<2x256xf32, #tpu.memory_space<vmem>>, %arg12: memref<2x64xf32, #tpu.memory_space<vmem>>, %arg13: memref<256x64xf32, #tpu.memory_space<vmem>>, %arg14: memref<1x8x64xf32, #tpu.memory_space<vmem>>, %arg15: memref<36x256xf32, #tpu.memory_space<vmem>>) attributes {dimension_semantics = [#tpu.dimension_semantics<parallel>], iteration_bounds = array<i64: 2>, scalar_prefetch = 0 : i64, scratch_operands = 1 : i64, tpu.core_type = #tpu.core_type<tc>, window_params = [{transform_indices = @transform_0, window_bounds = array<i64: 1, 4, 256>}, {pipeline_mode = #tpu.pipeline_mode<synchronous>, transform_indices = @transform_1, window_bounds = array<i64: 4, 1>}, {pipeline_mode = #tpu.pipeline_mode<synchronous>, transform_indices = @transform_2, window_bounds = array<i64: 4, 1>}, {pipeline_mode = #tpu.pipeline_mode<synchronous>, transform_indices = @transform_3, window_bounds = array<i64: 4, 1>}, {pipeline_mode = #tpu.pipeline_mode<synchronous>, transform_indices = @transform_4, window_bounds = array<i64: 4, 1>}, {pipeline_mode = #tpu.pipeline_mode<synchronous>, transform_indices = @transform_5, window_bounds = array<i64: 4, 36>}, {pipeline_mode = #tpu.pipeline_mode<synchronous>, transform_indices = @transform_6, window_bounds = array<i64: 4, 1>}, {pipeline_mode = #tpu.pipeline_mode<synchronous>, transform_indices = @transform_7, window_bounds = array<i64: 8, 36>}, {pipeline_mode = #tpu.pipeline_mode<synchronous>, transform_indices = @transform_8, window_bounds = array<i64: 8, 1>}, {pipeline_mode = #tpu.pipeline_mode<synchronous>, transform_indices = @transform_9, window_bounds = array<i64: 8, 4>}, {pipeline_mode = #tpu.pipeline_mode<synchronous>, transform_indices = @transform_10, window_bounds = array<i64: 2, 256>}, {pipeline_mode = #tpu.pipeline_mode<synchronous>, transform_indices = @transform_11, window_bounds = array<i64: 2, 64>}, {pipeline_mode = #tpu.pipeline_mode<synchronous>, transform_indices = @transform_12, window_bounds = array<i64: 256, 64>}, {transform_indices = @transform_13, window_bounds = array<i64: 1, 8, 64>}]} {
    %c0 = arith.constant 0 : index
    %c0_0 = arith.constant 0 : index
    %c0_1 = arith.constant 0 : index
    %0 = vector.load %arg1[%c0, %c0_0, %c0_1] : memref<1x4x256xf32, #tpu.memory_space<vmem>>, vector<1x4x256xf32>
    %1 = vector.shape_cast %0 : vector<1x4x256xf32> to vector<4x256xf32>
    %c0_2 = arith.constant 0 : index
    %c0_3 = arith.constant 0 : index
    %2 = vector.load %arg13[%c0_2, %c0_3] : memref<256x64xf32, #tpu.memory_space<vmem>>, vector<256x64xf32>
    %cst = arith.constant dense<0.000000e+00> : vector<4x64xf32>
    %3 = tpu.matmul %1, %2, %cst {dimension_numbers = #tpu.dot_dimension_numbers<[1], [0], [0], [1], [0, 0, 1, 1], [], []>} : vector<4x256xf32>, vector<256x64xf32>, vector<4x64xf32> -> vector<4x64xf32>
    %c0_4 = arith.constant 0 : index
    %c0_5 = arith.constant 0 : index
    %4 = vector.load %arg10[%c0_4, %c0_5] : memref<8x4xbf16, #tpu.memory_space<vmem>>, vector<8x4xbf16>
    %5 = arith.truncf %3 : vector<4x64xf32> to vector<4x64xbf16>
    %cst_6 = arith.constant dense<0.000000e+00> : vector<8x64xf32>
    %6 = tpu.matmul %4, %5, %cst_6 {dimension_numbers = #tpu.dot_dimension_numbers<[1], [0], [0], [1], [0, 0, 1, 1], [], []>} : vector<8x4xbf16>, vector<4x64xbf16>, vector<8x64xf32> -> vector<8x64xf32>
    %c0_7 = arith.constant 0 : index
    %c0_8 = arith.constant 0 : index
    %7 = vector.load %arg2[%c0_7, %c0_8] : memref<4x1xf32, #tpu.memory_space<vmem>>, vector<4x1xf32>
    %c0_9 = arith.constant 0 : index
    %c0_10 = arith.constant 0 : index
    %8 = vector.load %arg3[%c0_9, %c0_10] : memref<4x1xf32, #tpu.memory_space<vmem>>, vector<4x1xf32>
    %cst_11 = arith.constant dense<0.000000e+00> : vector<4xf32>
    %9 = vector.multi_reduction <add>, %1, %cst_11 [1] : vector<4x256xf32> to vector<4xf32>
    %10 = vector.shape_cast %9 : vector<4xf32> to vector<4x1xf32>
    %cst_12 = arith.constant 2.560000e+02 : f32
    %11 = vector.broadcast %cst_12 : f32 to vector<4x1xf32>
    %12 = arith.divf %10, %11 : vector<4x1xf32>
    %13 = vector.broadcast %12 : vector<4x1xf32> to vector<4x256xf32>
    %14 = arith.subf %1, %13 : vector<4x256xf32>
    %15 = arith.mulf %14, %14 : vector<4x256xf32>
    %cst_13 = arith.constant dense<0.000000e+00> : vector<4xf32>
    %16 = vector.multi_reduction <add>, %15, %cst_13 [1] : vector<4x256xf32> to vector<4xf32>
    %17 = vector.shape_cast %16 : vector<4xf32> to vector<4x1xf32>
    %cst_14 = arith.constant 2.560000e+02 : f32
    %18 = vector.broadcast %cst_14 : f32 to vector<4x1xf32>
    %19 = arith.divf %17, %18 : vector<4x1xf32>
    %cst_15 = arith.constant 9.99999974E-6 : f32
    %20 = vector.broadcast %cst_15 : f32 to vector<4x1xf32>
    %21 = arith.addf %19, %20 : vector<4x1xf32>
    %22 = math.rsqrt %21 : vector<4x1xf32>
    %23 = arith.mulf %7, %22 : vector<4x1xf32>
    %24 = vector.broadcast %23 : vector<4x1xf32> to vector<4x256xf32>
    %25 = arith.mulf %1, %24 : vector<4x256xf32>
    %26 = arith.mulf %23, %12 : vector<4x1xf32>
    %27 = arith.subf %8, %26 : vector<4x1xf32>
    %28 = vector.broadcast %27 : vector<4x1xf32> to vector<4x256xf32>
    %29 = arith.addf %25, %28 : vector<4x256xf32>
    %cst_16 = arith.constant 0.000000e+00 : f32
    %30 = vector.broadcast %cst_16 : f32 to vector<4x256xf32>
    %31 = arith.cmpf oge, %29, %30 : vector<4x256xf32>
    %cst_17 = arith.constant 2.000000e-01 : f32
    %32 = vector.broadcast %cst_17 : f32 to vector<4x256xf32>
    %33 = arith.mulf %32, %29 : vector<4x256xf32>
    %34 = arith.select %31, %29, %33 : vector<4x256xi1>, vector<4x256xf32>
    %c0_18 = arith.constant 0 : index
    %c0_19 = arith.constant 0 : index
    %35 = vector.load %arg11[%c0_18, %c0_19] : memref<2x256xf32, #tpu.memory_space<vmem>>, vector<1x256xf32>
    %c1 = arith.constant 1 : index
    %c0_20 = arith.constant 0 : index
    %36 = vector.load %arg11[%c1, %c0_20] : memref<2x256xf32, #tpu.memory_space<vmem>>, vector<1x256xf32>
    %cst_21 = arith.constant 0.000000e+00 : f32
    %37 = vector.broadcast %cst_21 : f32 to vector<4x17xf32>
    %38 = vector.extract_strided_slice %34 {offsets = [0, 0], sizes = [4, 239], strides = [1, 1]} : vector<4x256xf32> to vector<4x239xf32>
    %39 = tpu.concatenate %37, %38 in 1 : vector<4x17xf32>, vector<4x239xf32> -> vector<4x256xf32>
    %40 = vector.broadcast %35 : vector<1x256xf32> to vector<4x256xf32>
    %41 = arith.mulf %39, %40 : vector<4x256xf32>
    %c0_22 = arith.constant 0 : index
    %c0_23 = arith.constant 0 : index
    %42 = vector.load %arg15[%c0_22, %c0_23] : memref<36x256xf32, #tpu.memory_space<vmem>>, vector<4x256xf32>
    tpu.vector_store %arg15[%c0_22, %c0_23], %41 {strides = array<i32>} : memref<36x256xf32, #tpu.memory_space<vmem>>, vector<4x256xf32>,
    %cst_24 = arith.constant 0.000000e+00 : f32
    %43 = vector.broadcast %cst_24 : f32 to vector<4x16xf32>
    %44 = vector.extract_strided_slice %34 {offsets = [0, 0], sizes = [4, 240], strides = [1, 1]} : vector<4x256xf32> to vector<4x240xf32>
    %45 = tpu.concatenate %43, %44 in 1 : vector<4x16xf32>, vector<4x240xf32> -> vector<4x256xf32>
    %c4 = arith.constant 4 : index
    %c0_25 = arith.constant 0 : index
    %46 = vector.load %arg15[%c4, %c0_25] : memref<36x256xf32, #tpu.memory_space<vmem>>, vector<4x256xf32>
    tpu.vector_store %arg15[%c4, %c0_25], %45 {strides = array<i32>} : memref<36x256xf32, #tpu.memory_space<vmem>>, vector<4x256xf32>,
    %cst_26 = arith.constant 0.000000e+00 : f32
    %47 = vector.broadcast %cst_26 : f32 to vector<4x15xf32>
    %48 = vector.extract_strided_slice %34 {offsets = [0, 0], sizes = [4, 241], strides = [1, 1]} : vector<4x256xf32> to vector<4x241xf32>
    %49 = tpu.concatenate %47, %48 in 1 : vector<4x15xf32>, vector<4x241xf32> -> vector<4x256xf32>
    %50 = vector.broadcast %36 : vector<1x256xf32> to vector<4x256xf32>
    %51 = arith.mulf %49, %50 : vector<4x256xf32>
    %c8 = arith.constant 8 : index
    %c0_27 = arith.constant 0 : index
    %52 = vector.load %arg15[%c8, %c0_27] : memref<36x256xf32, #tpu.memory_space<vmem>>, vector<4x256xf32>
    tpu.vector_store %arg15[%c8, %c0_27], %51 {strides = array<i32>} : memref<36x256xf32, #tpu.memory_space<vmem>>, vector<4x256xf32>,
    %cst_28 = arith.constant 0.000000e+00 : f32
    %53 = vector.broadcast %cst_28 : f32 to vector<4x1xf32>
    %54 = vector.extract_strided_slice %34 {offsets = [0, 0], sizes = [4, 255], strides = [1, 1]} : vector<4x256xf32> to vector<4x255xf32>
    %55 = tpu.concatenate %53, %54 in 1 : vector<4x1xf32>, vector<4x255xf32> -> vector<4x256xf32>
    %56 = vector.broadcast %35 : vector<1x256xf32> to vector<4x256xf32>
    %57 = arith.mulf %55, %56 : vector<4x256xf32>
    %c12 = arith.constant 12 : index
    %c0_29 = arith.constant 0 : index
    %58 = vector.load %arg15[%c12, %c0_29] : memref<36x256xf32, #tpu.memory_space<vmem>>, vector<4x256xf32>
    tpu.vector_store %arg15[%c12, %c0_29], %57 {strides = array<i32>} : memref<36x256xf32, #tpu.memory_space<vmem>>, vector<4x256xf32>,
    %c16 = arith.constant 16 : index
    %c0_30 = arith.constant 0 : index
    %59 = vector.load %arg15[%c16, %c0_30] : memref<36x256xf32, #tpu.memory_space<vmem>>, vector<4x256xf32>
    tpu.vector_store %arg15[%c16, %c0_30], %34 {strides = array<i32>} : memref<36x256xf32, #tpu.memory_space<vmem>>, vector<4x256xf32>,
    %60 = vector.extract_strided_slice %34 {offsets = [0, 1], sizes = [4, 255], strides = [1, 1]} : vector<4x256xf32> to vector<4x255xf32>
    %cst_31 = arith.constant 0.000000e+00 : f32
    %61 = vector.broadcast %cst_31 : f32 to vector<4x1xf32>
    %62 = tpu.concatenate %60, %61 in 1 : vector<4x255xf32>, vector<4x1xf32> -> vector<4x256xf32>
    %63 = vector.broadcast %36 : vector<1x256xf32> to vector<4x256xf32>
    %64 = arith.mulf %62, %63 : vector<4x256xf32>
    %c20 = arith.constant 20 : index
    %c0_32 = arith.constant 0 : index
    %65 = vector.load %arg15[%c20, %c0_32] : memref<36x256xf32, #tpu.memory_space<vmem>>, vector<4x256xf32>
    tpu.vector_store %arg15[%c20, %c0_32], %64 {strides = array<i32>} : memref<36x256xf32, #tpu.memory_space<vmem>>, vector<4x256xf32>,
    %66 = vector.extract_strided_slice %34 {offsets = [0, 15], sizes = [4, 241], strides = [1, 1]} : vector<4x256xf32> to vector<4x241xf32>
    %cst_33 = arith.constant 0.000000e+00 : f32
    %67 = vector.broadcast %cst_33 : f32 to vector<4x15xf32>
    %68 = tpu.concatenate %66, %67 in 1 : vector<4x241xf32>, vector<4x15xf32> -> vector<4x256xf32>
    %69 = vector.broadcast %35 : vector<1x256xf32> to vector<4x256xf32>
    %70 = arith.mulf %68, %69 : vector<4x256xf32>
    %c24 = arith.constant 24 : index
    %c0_34 = arith.constant 0 : index
    %71 = vector.load %arg15[%c24, %c0_34] : memref<36x256xf32, #tpu.memory_space<vmem>>, vector<4x256xf32>
    tpu.vector_store %arg15[%c24, %c0_34], %70 {strides = array<i32>} : memref<36x256xf32, #tpu.memory_space<vmem>>, vector<4x256xf32>,
    %72 = vector.extract_strided_slice %34 {offsets = [0, 16], sizes = [4, 240], strides = [1, 1]} : vector<4x256xf32> to vector<4x240xf32>
    %cst_35 = arith.constant 0.000000e+00 : f32
    %73 = vector.broadcast %cst_35 : f32 to vector<4x16xf32>
    %74 = tpu.concatenate %72, %73 in 1 : vector<4x240xf32>, vector<4x16xf32> -> vector<4x256xf32>
    %c28 = arith.constant 28 : index
    %c0_36 = arith.constant 0 : index
    %75 = vector.load %arg15[%c28, %c0_36] : memref<36x256xf32, #tpu.memory_space<vmem>>, vector<4x256xf32>
    tpu.vector_store %arg15[%c28, %c0_36], %74 {strides = array<i32>} : memref<36x256xf32, #tpu.memory_space<vmem>>, vector<4x256xf32>,
    %76 = vector.extract_strided_slice %34 {offsets = [0, 17], sizes = [4, 239], strides = [1, 1]} : vector<4x256xf32> to vector<4x239xf32>
    %cst_37 = arith.constant 0.000000e+00 : f32
    %77 = vector.broadcast %cst_37 : f32 to vector<4x17xf32>
    %78 = tpu.concatenate %76, %77 in 1 : vector<4x239xf32>, vector<4x17xf32> -> vector<4x256xf32>
    %79 = vector.broadcast %36 : vector<1x256xf32> to vector<4x256xf32>
    %80 = arith.mulf %78, %79 : vector<4x256xf32>
    %c32 = arith.constant 32 : index
    %c0_38 = arith.constant 0 : index
    %81 = vector.load %arg15[%c32, %c0_38] : memref<36x256xf32, #tpu.memory_space<vmem>>, vector<4x256xf32>
    tpu.vector_store %arg15[%c32, %c0_38], %80 {strides = array<i32>} : memref<36x256xf32, #tpu.memory_space<vmem>>, vector<4x256xf32>,
    %c0_39 = arith.constant 0 : index
    %c0_40 = arith.constant 0 : index
    %82 = vector.load %arg15[%c0_39, %c0_40] : memref<36x256xf32, #tpu.memory_space<vmem>>, vector<36x256xf32>
    %83 = arith.truncf %82 : vector<36x256xf32> to vector<36x256xbf16>
    %c0_41 = arith.constant 0 : index
    %c0_42 = arith.constant 0 : index
    %84 = vector.load %arg6[%c0_41, %c0_42] : memref<4x36xbf16, #tpu.memory_space<vmem>>, vector<4x36xbf16>
    %cst_43 = arith.constant dense<0.000000e+00> : vector<4x256xf32>
    %85 = tpu.matmul %84, %83, %cst_43 {dimension_numbers = #tpu.dot_dimension_numbers<[1], [0], [0], [1], [0, 0, 1, 1], [], []>} : vector<4x36xbf16>, vector<36x256xbf16>, vector<4x256xf32> -> vector<4x256xf32>
    %c0_44 = arith.constant 0 : index
    %c0_45 = arith.constant 0 : index
    %86 = vector.load %arg7[%c0_44, %c0_45] : memref<4x1xf32, #tpu.memory_space<vmem>>, vector<4x1xf32>
    %87 = vector.broadcast %86 : vector<4x1xf32> to vector<4x256xf32>
    %88 = arith.addf %85, %87 : vector<4x256xf32>
    %c0_46 = arith.constant 0 : index
    %c0_47 = arith.constant 0 : index
    %89 = vector.load %arg13[%c0_46, %c0_47] : memref<256x64xf32, #tpu.memory_space<vmem>>, vector<256x64xf32>
    %cst_48 = arith.constant dense<0.000000e+00> : vector<4x64xf32>
    %90 = tpu.matmul %88, %89, %cst_48 {dimension_numbers = #tpu.dot_dimension_numbers<[1], [0], [0], [1], [0, 0, 1, 1], [], []>} : vector<4x256xf32>, vector<256x64xf32>, vector<4x64xf32> -> vector<4x64xf32>
    %c0_49 = arith.constant 0 : index
    %c0_50 = arith.constant 0 : index
    %91 = vector.load %arg4[%c0_49, %c0_50] : memref<4x1xf32, #tpu.memory_space<vmem>>, vector<4x1xf32>
    %c0_51 = arith.constant 0 : index
    %c0_52 = arith.constant 0 : index
    %92 = vector.load %arg5[%c0_51, %c0_52] : memref<4x1xf32, #tpu.memory_space<vmem>>, vector<4x1xf32>
    %cst_53 = arith.constant dense<0.000000e+00> : vector<4xf32>
    %93 = vector.multi_reduction <add>, %90, %cst_53 [1] : vector<4x64xf32> to vector<4xf32>
    %94 = vector.shape_cast %93 : vector<4xf32> to vector<4x1xf32>
    %cst_54 = arith.constant 6.400000e+01 : f32
    %95 = vector.broadcast %cst_54 : f32 to vector<4x1xf32>
    %96 = arith.divf %94, %95 : vector<4x1xf32>
    %97 = vector.broadcast %96 : vector<4x1xf32> to vector<4x64xf32>
    %98 = arith.subf %90, %97 : vector<4x64xf32>
    %99 = arith.mulf %98, %98 : vector<4x64xf32>
    %cst_55 = arith.constant dense<0.000000e+00> : vector<4xf32>
    %100 = vector.multi_reduction <add>, %99, %cst_55 [1] : vector<4x64xf32> to vector<4xf32>
    %101 = vector.shape_cast %100 : vector<4xf32> to vector<4x1xf32>
    %cst_56 = arith.constant 6.400000e+01 : f32
    %102 = vector.broadcast %cst_56 : f32 to vector<4x1xf32>
    %103 = arith.divf %101, %102 : vector<4x1xf32>
    %cst_57 = arith.constant 9.99999974E-6 : f32
    %104 = vector.broadcast %cst_57 : f32 to vector<4x1xf32>
    %105 = arith.addf %103, %104 : vector<4x1xf32>
    %106 = math.rsqrt %105 : vector<4x1xf32>
    %107 = arith.mulf %91, %106 : vector<4x1xf32>
    %108 = vector.broadcast %107 : vector<4x1xf32> to vector<4x64xf32>
    %109 = arith.mulf %90, %108 : vector<4x64xf32>
    %110 = arith.mulf %107, %96 : vector<4x1xf32>
    %111 = arith.subf %92, %110 : vector<4x1xf32>
    %112 = vector.broadcast %111 : vector<4x1xf32> to vector<4x64xf32>
    %113 = arith.addf %109, %112 : vector<4x64xf32>
    %cst_58 = arith.constant 0.000000e+00 : f32
    %114 = vector.broadcast %cst_58 : f32 to vector<4x64xf32>
    %115 = arith.cmpf oge, %113, %114 : vector<4x64xf32>
    %cst_59 = arith.constant 2.000000e-01 : f32
    %116 = vector.broadcast %cst_59 : f32 to vector<4x64xf32>
    %117 = arith.mulf %116, %113 : vector<4x64xf32>
    %118 = arith.select %115, %113, %117 : vector<4x64xi1>, vector<4x64xf32>
    %c0_60 = arith.constant 0 : index
    %c0_61 = arith.constant 0 : index
    %119 = vector.load %arg12[%c0_60, %c0_61] : memref<2x64xf32, #tpu.memory_space<vmem>>, vector<1x64xf32>
    %c1_62 = arith.constant 1 : index
    %c0_63 = arith.constant 0 : index
    %120 = vector.load %arg12[%c1_62, %c0_63] : memref<2x64xf32, #tpu.memory_space<vmem>>, vector<1x64xf32>
    %cst_64 = arith.constant 0.000000e+00 : f32
    %121 = vector.broadcast %cst_64 : f32 to vector<4x9xf32>
    %122 = vector.extract_strided_slice %118 {offsets = [0, 0], sizes = [4, 55], strides = [1, 1]} : vector<4x64xf32> to vector<4x55xf32>
    %123 = tpu.concatenate %121, %122 in 1 : vector<4x9xf32>, vector<4x55xf32> -> vector<4x64xf32>
    %124 = vector.broadcast %119 : vector<1x64xf32> to vector<4x64xf32>
    %125 = arith.mulf %123, %124 : vector<4x64xf32>
    %c0_65 = arith.constant 0 : index
    %c0_66 = arith.constant 0 : index
    %126 = vector.load %arg15[%c0_65, %c0_66] : memref<36x256xf32, #tpu.memory_space<vmem>>, vector<4x64xf32>
    tpu.vector_store %arg15[%c0_65, %c0_66], %125 {strides = array<i32>} : memref<36x256xf32, #tpu.memory_space<vmem>>, vector<4x64xf32>,
    %cst_67 = arith.constant 0.000000e+00 : f32
    %127 = vector.broadcast %cst_67 : f32 to vector<4x8xf32>
    %128 = vector.extract_strided_slice %118 {offsets = [0, 0], sizes = [4, 56], strides = [1, 1]} : vector<4x64xf32> to vector<4x56xf32>
    %129 = tpu.concatenate %127, %128 in 1 : vector<4x8xf32>, vector<4x56xf32> -> vector<4x64xf32>
    %c4_68 = arith.constant 4 : index
    %c0_69 = arith.constant 0 : index
    %130 = vector.load %arg15[%c4_68, %c0_69] : memref<36x256xf32, #tpu.memory_space<vmem>>, vector<4x64xf32>
    tpu.vector_store %arg15[%c4_68, %c0_69], %129 {strides = array<i32>} : memref<36x256xf32, #tpu.memory_space<vmem>>, vector<4x64xf32>,
    %cst_70 = arith.constant 0.000000e+00 : f32
    %131 = vector.broadcast %cst_70 : f32 to vector<4x7xf32>
    %132 = vector.extract_strided_slice %118 {offsets = [0, 0], sizes = [4, 57], strides = [1, 1]} : vector<4x64xf32> to vector<4x57xf32>
    %133 = tpu.concatenate %131, %132 in 1 : vector<4x7xf32>, vector<4x57xf32> -> vector<4x64xf32>
    %134 = vector.broadcast %120 : vector<1x64xf32> to vector<4x64xf32>
    %135 = arith.mulf %133, %134 : vector<4x64xf32>
    %c8_71 = arith.constant 8 : index
    %c0_72 = arith.constant 0 : index
    %136 = vector.load %arg15[%c8_71, %c0_72] : memref<36x256xf32, #tpu.memory_space<vmem>>, vector<4x64xf32>
    tpu.vector_store %arg15[%c8_71, %c0_72], %135 {strides = array<i32>} : memref<36x256xf32, #tpu.memory_space<vmem>>, vector<4x64xf32>,
    %cst_73 = arith.constant 0.000000e+00 : f32
    %137 = vector.broadcast %cst_73 : f32 to vector<4x1xf32>
    %138 = vector.extract_strided_slice %118 {offsets = [0, 0], sizes = [4, 63], strides = [1, 1]} : vector<4x64xf32> to vector<4x63xf32>
    %139 = tpu.concatenate %137, %138 in 1 : vector<4x1xf32>, vector<4x63xf32> -> vector<4x64xf32>
    %140 = vector.broadcast %119 : vector<1x64xf32> to vector<4x64xf32>
    %141 = arith.mulf %139, %140 : vector<4x64xf32>
    %c12_74 = arith.constant 12 : index
    %c0_75 = arith.constant 0 : index
    %142 = vector.load %arg15[%c12_74, %c0_75] : memref<36x256xf32, #tpu.memory_space<vmem>>, vector<4x64xf32>
    tpu.vector_store %arg15[%c12_74, %c0_75], %141 {strides = array<i32>} : memref<36x256xf32, #tpu.memory_space<vmem>>, vector<4x64xf32>,
    %c16_76 = arith.constant 16 : index
    %c0_77 = arith.constant 0 : index
    %143 = vector.load %arg15[%c16_76, %c0_77] : memref<36x256xf32, #tpu.memory_space<vmem>>, vector<4x64xf32>
    tpu.vector_store %arg15[%c16_76, %c0_77], %118 {strides = array<i32>} : memref<36x256xf32, #tpu.memory_space<vmem>>, vector<4x64xf32>,
    %144 = vector.extract_strided_slice %118 {offsets = [0, 1], sizes = [4, 63], strides = [1, 1]} : vector<4x64xf32> to vector<4x63xf32>
    %cst_78 = arith.constant 0.000000e+00 : f32
    %145 = vector.broadcast %cst_78 : f32 to vector<4x1xf32>
    %146 = tpu.concatenate %144, %145 in 1 : vector<4x63xf32>, vector<4x1xf32> -> vector<4x64xf32>
    %147 = vector.broadcast %120 : vector<1x64xf32> to vector<4x64xf32>
    %148 = arith.mulf %146, %147 : vector<4x64xf32>
    %c20_79 = arith.constant 20 : index
    %c0_80 = arith.constant 0 : index
    %149 = vector.load %arg15[%c20_79, %c0_80] : memref<36x256xf32, #tpu.memory_space<vmem>>, vector<4x64xf32>
    tpu.vector_store %arg15[%c20_79, %c0_80], %148 {strides = array<i32>} : memref<36x256xf32, #tpu.memory_space<vmem>>, vector<4x64xf32>,
    %150 = vector.extract_strided_slice %118 {offsets = [0, 7], sizes = [4, 57], strides = [1, 1]} : vector<4x64xf32> to vector<4x57xf32>
    %cst_81 = arith.constant 0.000000e+00 : f32
    %151 = vector.broadcast %cst_81 : f32 to vector<4x7xf32>
    %152 = tpu.concatenate %150, %151 in 1 : vector<4x57xf32>, vector<4x7xf32> -> vector<4x64xf32>
    %153 = vector.broadcast %119 : vector<1x64xf32> to vector<4x64xf32>
    %154 = arith.mulf %152, %153 : vector<4x64xf32>
    %c24_82 = arith.constant 24 : index
    %c0_83 = arith.constant 0 : index
    %155 = vector.load %arg15[%c24_82, %c0_83] : memref<36x256xf32, #tpu.memory_space<vmem>>, vector<4x64xf32>
    tpu.vector_store %arg15[%c24_82, %c0_83], %154 {strides = array<i32>} : memref<36x256xf32, #tpu.memory_space<vmem>>, vector<4x64xf32>,
    %156 = vector.extract_strided_slice %118 {offsets = [0, 8], sizes = [4, 56], strides = [1, 1]} : vector<4x64xf32> to vector<4x56xf32>
    %cst_84 = arith.constant 0.000000e+00 : f32
    %157 = vector.broadcast %cst_84 : f32 to vector<4x8xf32>
    %158 = tpu.concatenate %156, %157 in 1 : vector<4x56xf32>, vector<4x8xf32> -> vector<4x64xf32>
    %c28_85 = arith.constant 28 : index
    %c0_86 = arith.constant 0 : index
    %159 = vector.load %arg15[%c28_85, %c0_86] : memref<36x256xf32, #tpu.memory_space<vmem>>, vector<4x64xf32>
    tpu.vector_store %arg15[%c28_85, %c0_86], %158 {strides = array<i32>} : memref<36x256xf32, #tpu.memory_space<vmem>>, vector<4x64xf32>,
    %160 = vector.extract_strided_slice %118 {offsets = [0, 9], sizes = [4, 55], strides = [1, 1]} : vector<4x64xf32> to vector<4x55xf32>
    %cst_87 = arith.constant 0.000000e+00 : f32
    %161 = vector.broadcast %cst_87 : f32 to vector<4x9xf32>
    %162 = tpu.concatenate %160, %161 in 1 : vector<4x55xf32>, vector<4x9xf32> -> vector<4x64xf32>
    %163 = vector.broadcast %120 : vector<1x64xf32> to vector<4x64xf32>
    %164 = arith.mulf %162, %163 : vector<4x64xf32>
    %c32_88 = arith.constant 32 : index
    %c0_89 = arith.constant 0 : index
    %165 = vector.load %arg15[%c32_88, %c0_89] : memref<36x256xf32, #tpu.memory_space<vmem>>, vector<4x64xf32>
    tpu.vector_store %arg15[%c32_88, %c0_89], %164 {strides = array<i32>} : memref<36x256xf32, #tpu.memory_space<vmem>>, vector<4x64xf32>,
    %c0_90 = arith.constant 0 : index
    %c0_91 = arith.constant 0 : index
    %166 = vector.load %arg15[%c0_90, %c0_91] : memref<36x256xf32, #tpu.memory_space<vmem>>, vector<36x64xf32>
    %167 = arith.truncf %166 : vector<36x64xf32> to vector<36x64xbf16>
    %c0_92 = arith.constant 0 : index
    %c0_93 = arith.constant 0 : index
    %168 = vector.load %arg8[%c0_92, %c0_93] : memref<8x36xbf16, #tpu.memory_space<vmem>>, vector<8x36xbf16>
    %cst_94 = arith.constant dense<0.000000e+00> : vector<8x64xf32>
    %169 = tpu.matmul %168, %167, %cst_94 {dimension_numbers = #tpu.dot_dimension_numbers<[1], [0], [0], [1], [0, 0, 1, 1], [], []>} : vector<8x36xbf16>, vector<36x64xbf16>, vector<8x64xf32> -> vector<8x64xf32>
    %c0_95 = arith.constant 0 : index
    %c0_96 = arith.constant 0 : index
    %170 = vector.load %arg9[%c0_95, %c0_96] : memref<8x1xf32, #tpu.memory_space<vmem>>, vector<8x1xf32>
    %171 = vector.broadcast %170 : vector<8x1xf32> to vector<8x64xf32>
    %172 = arith.addf %169, %171 : vector<8x64xf32>
    %173 = arith.addf %172, %6 : vector<8x64xf32>
    %cst_97 = arith.constant 0.707106769 : f32
    %174 = vector.broadcast %cst_97 : f32 to vector<8x64xf32>
    %175 = arith.mulf %173, %174 : vector<8x64xf32>
    %176 = vector.shape_cast %175 : vector<8x64xf32> to vector<1x8x64xf32>
    %c0_98 = arith.constant 0 : index
    %c0_99 = arith.constant 0 : index
    %c0_100 = arith.constant 0 : index
    %177 = vector.load %arg14[%c0_98, %c0_99, %c0_100] : memref<1x8x64xf32, #tpu.memory_space<vmem>>, vector<1x8x64xf32>
    tpu.vector_store %arg14[%c0_98, %c0_99, %c0_100], %176 {strides = array<i32>} : memref<1x8x64xf32, #tpu.memory_space<vmem>>, vector<1x8x64xf32>,
    return
  }
  func.func @transform_0(%arg0: i32) -> (i32, i32, i32) {
    %c0_i32 = arith.constant 0 : i32
    %c0_i32_0 = arith.constant 0 : i32
    %c0_i32_1 = arith.constant 0 : i32
    return %arg0, %c0_i32, %c0_i32_0 : i32, i32, i32
  }
  func.func @transform_1(%arg0: i32) -> (i32, i32) {
    %c0_i32 = arith.constant 0 : i32
    %c0_i32_0 = arith.constant 0 : i32
    %c0_i32_1 = arith.constant 0 : i32
    return %c0_i32, %c0_i32_0 : i32, i32
  }
  func.func @transform_2(%arg0: i32) -> (i32, i32) {
    %c0_i32 = arith.constant 0 : i32
    %c0_i32_0 = arith.constant 0 : i32
    %c0_i32_1 = arith.constant 0 : i32
    return %c0_i32, %c0_i32_0 : i32, i32
  }
  func.func @transform_3(%arg0: i32) -> (i32, i32) {
    %c0_i32 = arith.constant 0 : i32
    %c0_i32_0 = arith.constant 0 : i32
    %c0_i32_1 = arith.constant 0 : i32
    return %c0_i32, %c0_i32_0 : i32, i32
  }
  func.func @transform_4(%arg0: i32) -> (i32, i32) {
    %c0_i32 = arith.constant 0 : i32
    %c0_i32_0 = arith.constant 0 : i32
    %c0_i32_1 = arith.constant 0 : i32
    return %c0_i32, %c0_i32_0 : i32, i32
  }
  func.func @transform_5(%arg0: i32) -> (i32, i32) {
    %c0_i32 = arith.constant 0 : i32
    %c0_i32_0 = arith.constant 0 : i32
    %c0_i32_1 = arith.constant 0 : i32
    return %c0_i32, %c0_i32_0 : i32, i32
  }
  func.func @transform_6(%arg0: i32) -> (i32, i32) {
    %c0_i32 = arith.constant 0 : i32
    %c0_i32_0 = arith.constant 0 : i32
    %c0_i32_1 = arith.constant 0 : i32
    return %c0_i32, %c0_i32_0 : i32, i32
  }
  func.func @transform_7(%arg0: i32) -> (i32, i32) {
    %c0_i32 = arith.constant 0 : i32
    %c0_i32_0 = arith.constant 0 : i32
    %c0_i32_1 = arith.constant 0 : i32
    return %c0_i32, %c0_i32_0 : i32, i32
  }
  func.func @transform_8(%arg0: i32) -> (i32, i32) {
    %c0_i32 = arith.constant 0 : i32
    %c0_i32_0 = arith.constant 0 : i32
    %c0_i32_1 = arith.constant 0 : i32
    return %c0_i32, %c0_i32_0 : i32, i32
  }
  func.func @transform_9(%arg0: i32) -> (i32, i32) {
    %c0_i32 = arith.constant 0 : i32
    %c0_i32_0 = arith.constant 0 : i32
    %c0_i32_1 = arith.constant 0 : i32
    return %c0_i32, %c0_i32_0 : i32, i32
  }
  func.func @transform_10(%arg0: i32) -> (i32, i32) {
    %c0_i32 = arith.constant 0 : i32
    %c0_i32_0 = arith.constant 0 : i32
    %c0_i32_1 = arith.constant 0 : i32
    return %c0_i32, %c0_i32_0 : i32, i32
  }
  func.func @transform_11(%arg0: i32) -> (i32, i32) {
    %c0_i32 = arith.constant 0 : i32
    %c0_i32_0 = arith.constant 0 : i32
    %c0_i32_1 = arith.constant 0 : i32
    return %c0_i32, %c0_i32_0 : i32, i32
  }
  func.func @transform_12(%arg0: i32) -> (i32, i32) {
    %c0_i32 = arith.constant 0 : i32
    %c0_i32_0 = arith.constant 0 : i32
    %c0_i32_1 = arith.constant 0 : i32
    return %c0_i32, %c0_i32_0 : i32, i32
  }
  func.func @transform_13(%arg0: i32) -> (i32, i32, i32) {
    %c0_i32 = arith.constant 0 : i32
    %c0_i32_0 = arith.constant 0 : i32
    %c0_i32_1 = arith.constant 0 : i32
    return %arg0, %c0_i32, %c0_i32_0 : i32, i32, i32
  }
}

</mosaic_0001>

<bundles_post_ra>
// kernel: tpu_custom_call.1
= control target key start
LH: loop header
LB: loop body
LE: loop exit
PB: predicated region body
PF: predicated region fallthrough
CT: control target
= control target key end

     0   :  { %s2009_s0 = inlined_call_operand.vmem [shape: f32[2,4,256], index: 0, kind: input, shape index: {}]   ;;  %s2010_s1 = inlined_call_operand.vmem [shape: f32[4,1], index: 1, kind: input, shape index: {}]   ;;  %s2011_s2 = inlined_call_operand.vmem [shape: f32[4,1], index: 2, kind: input, shape index: {}]   ;;  %s2012_s3 = inlined_call_operand.vmem [shape: f32[4,1], index: 3, kind: input, shape index: {}]   ;;  %s2013_s4 = inlined_call_operand.vmem [shape: f32[4,1], index: 4, kind: input, shape index: {}]   ;;  %s2014_s5 = inlined_call_operand.vmem [shape: bf16[4,36], index: 5, kind: input, shape index: {}]   ;;  %s2015_s6 = inlined_call_operand.vmem [shape: f32[4,1], index: 6, kind: input, shape index: {}]   ;;  %s2016_s7 = inlined_call_operand.vmem [shape: bf16[8,36], index: 7, kind: input, shape index: {}]   ;;  %s2017_s8 = inlined_call_operand.vmem [shape: f32[8,1], index: 8, kind: input, shape index: {}]   ;;  %s2018_s9 = inlined_call_operand.vmem [shape: bf16[8,4], index: 9, kind: input, shape index: {}]   ;;  %s2019_s10 = inlined_call_operand.vmem [shape: f32[2,256], index: 10, kind: input, shape index: {}]   ;;  %s2020_s11 = inlined_call_operand.vmem [shape: f32[2,64], index: 11, kind: input, shape index: {}]   ;;  %s2021_s12 = inlined_call_operand.vmem [shape: f32[256,64], index: 12, kind: input, shape index: {}]   ;;  %s2022_s13 = inlined_call_operand.hbm [shape: f32[2,8,64], index: 13, kind: output, shape index: {}]  }
   0x1   :  { %2023 = sst [smem:[#allocation7_spill]] %s2009_s0 }
   0x2   :  { %2024 = sst [smem:[#allocation8_spill]] %s2010_s1 }
   0x3   :  { %18 = vsyncpa [#allocation4], 0 }
   0x4   :  { %20 = vsyncpa [#allocation4 + $0x1], 0  ;;  %s1630_s25 = smov 0   ;;  %s1632_s26 = smov 0  }
   0x5   :  { %s1634_s27 = smov 0   ;;  %s1636_s28 = smov 0  }
   0x6 LB: > { %s1651_s29 = sadd.s32 4294967295, %s1539_s28   ;;  %s1236_s30 = sadd.s32 4294967294, %s1539_s28   ;;  %s1539_s28 = sphi %s1636_s28, %s2034_s28   ;;  %s1535_s27 = sphi %s1634_s27, %s2033_s27   ;;  %s1531_s26 = sphi %s1632_s26, %s2032_s26   ;;  %s1527_s25 = sphi %s1630_s25, %s2031_s25  }
   0x7   : > { %s1655_s14 = sadd.s32 1, %s1539_s28   ;;  %s311_s15 = sadd.s32 1, %s1535_s27 }
   0x8   : > { %s308_s16 = ssub.s32 %s1539_s28, %s1655_s14  ;;  %p321_p0 = scmp.ne.s32.totalorder %s1535_s27, %s1531_s26 }
   0x9   : > { %p309_p1 = scmp.eq.s32.totalorder %s308_s16, 0  ;;  %p322_p2 = scmp.eq.s32.totalorder %s1651_s29, 1 }
   0xa   : > { %p327_p3 = scmp.ne.s32.totalorder %s1531_s26, %s1527_s25  ;;  %p328_p4 = scmp.eq.s32.totalorder %s1236_s30, 1 }
   0xb   : > { %s1666_s17 = scalar_select %p309_p1, %s1535_s27, %s311_s15  }
   0xc   : > { %p1668_p5 = por %p322_p2, %p321_p0  ;;  %p1672_p6 = por %p328_p4, %p327_p3 }
   0xd   : > { %2025 = sst [smem:[#allocation6_spill]] %s1666_s17  ;;  %p1239_p7 = scmp.ge.s32.totalorder %s1539_s28, 1 }
   0xe   : > { %p390_p8 = scmp.lt.s32.totalorder %s1539_s28, 3 }
  0x10   : > { %p391_p9 = pnand %p1239_p7, %p390_p8 }
  0x11   : > { %p434_p10 = scmp.lt.s32.totalorder (!%p391_p9), %s1651_s29, 1  ;;  %vm598_vm0 = vcmask (!%p391_p9), 1043456   ;;  %s2028_s0 = sld [smem:[#allocation7_spill]] (!%p391_p9)  ;;  %v1541_v5 = vmov (!%p391_p9), 839922192   ;;  %v610_v7 = vlaneseq (!%p391_p9)  ;;  %v1542_v20 = vmov (!%p391_p9), 0  }
  0x12   : > { %394 = sbr.rel (%p391_p9) target bundleno = 1918 (0x77e), region = 72  ;;  %v608_v6 = vunpack.c.l.s4 (!%p391_p9), %v1541_v5  ;;  %1470 = vset.pattern.permute.xlu1 (!%p391_p9), %v1542_v20  ;;  %1471 = vset.pattern.permute.xlu0 (!%p391_p9), %v1542_v20  ;;  %v457_v21 = vld [vmem:[%s2021_s12 + $0x80] sm:$0xff] (!%p391_p9)  ;;  %v458_v22 = vld [vmem:[%s2021_s12 + $0x88] sm:$0xff] (!%p391_p9)  ;;  %v459_v26 = vld [vmem:[%s2021_s12 + $0x90] sm:$0xff] (!%p391_p9)  ;;  %s2029_s1 = sld [smem:[#allocation8_spill]] (!%p391_p9)  ;;  %vm552_vm2 = vcmask (!%p391_p9), 1041408  }
  0x13   : > { %v1690_v9 = vshrl.u32 (!%p391_p9), %v610_v7, 7  ;;  %v441_v23 = vld [vmem:[%s2021_s12] sm:$0xff] (!%p391_p9)  ;;  %v1713_v24 = vpack.c.bf16 (!%p391_p9), %v458_v22, %v457_v21  ;;  %v442_v25 = vld [vmem:[%s2021_s12 + $0x8] sm:$0xff] (!%p391_p9)  ;;  %v460_v27 = vld [vmem:[%s2021_s12 + $0x98] sm:$0xff] (!%p391_p9)  ;;  %s1544_s17 = smov (!%p391_p9), 1   ;;  %s1545_s30 = smov (!%p391_p9), 16  }
  0x14   : > { %v609_v8 = vunpack.c.0.s8 (!%p391_p9), %v608_v6  ;;  %v1724_v28 = vpack.c.bf16 (!%p391_p9), %v442_v25, %v441_v23  ;;  %v1726_v29 = vpack.c.bf16 (!%p391_p9), %v460_v27, %v459_v26  ;;  %v443_v30 = vld [vmem:[%s2021_s12 + $0x10] sm:$0xff] (!%p391_p9)  ;;  %v444_v31 = vld [vmem:[%s2021_s12 + $0x18] sm:$0xff] (!%p391_p9)  ;;  %v461_v32 = vld [vmem:[%s2021_s12 + $0xa0] sm:$0xff] (!%p391_p9)  ;;  %s1546_s15 = smov (!%p391_p9), 127   ;;  %s1547_s16 = smov (!%p391_p9), 15   ;;  %vm1552_vm3 = vmmov (!%p391_p9), 0  }
  0x15   : > { %1348 = vmatprep.subr.bf16.mxu0 (!%p391_p9), %v1713_v24  ;;  %v462_v33 = vld [vmem:[%s2021_s12 + $0xa8] sm:$0xff] (!%p391_p9)  ;;  %v1742_v34 = vpack.c.bf16 (!%p391_p9), %v444_v31, %v443_v30  ;;  %v445_v36 = vld [vmem:[%s2021_s12 + $0x20] sm:$0xff] (!%p391_p9)  ;;  %v463_v38 = vld [vmem:[%s2021_s12 + $0xb0] sm:$0xff] (!%p391_p9)  ;;  %s1550_s22 = smov (!%p391_p9), 111   ;;  %vm548_vm4 = vcmask (!%p391_p9), 31744   ;;  %vm669_vm5 = vcmask (!%p391_p9), 138240  }
  0x16   : > { %v1693_v10 = vsub.s32 (!%p391_p9), %v609_v8, %v1690_v9  ;;  %1350 = vmatpush3.bf16.msra.mxu0 (!%p391_p9), %v1724_v28  ;;  %v1745_v35 = vpack.c.bf16 (!%p391_p9), %v462_v33, %v461_v32  ;;  %v446_v37 = vld [vmem:[%s2021_s12 + $0x28] sm:$0xff] (!%p391_p9)  ;;  %v464_v39 = vld [vmem:[%s2021_s12 + $0xb8] sm:$0xff] (!%p391_p9)  ;;  %v447_v42 = vld [vmem:[%s2021_s12 + $0x30] sm:$0xff] (!%p391_p9)  ;;  %v1551_v33 = vmov (!%p391_p9), 0.0   ;;  %vm732_vm6 = vcmask (!%p391_p9), 7168   ;;  %s1555_s23 = smov (!%p391_p9), 9  }
  0x17   : > { %1352 = vmatprep.subr.bf16.mxu0 (!%p391_p9), %v1726_v29  ;;  %v1760_v40 = vpack.c.bf16 (!%p391_p9), %v446_v37, %v445_v36  ;;  %v1763_v41 = vpack.c.bf16 (!%p391_p9), %v464_v39, %v463_v38  ;;  %v448_v43 = vld [vmem:[%s2021_s12 + $0x38] sm:$0xff] (!%p391_p9)  ;;  %v465_v44 = vld [vmem:[%s2021_s12 + $0xc0] sm:$0xff] (!%p391_p9)  ;;  %v466_v45 = vld [vmem:[%s2021_s12 + $0xc8] sm:$0xff] (!%p391_p9)  ;;  %1331 = vmatprep.subr.bf16.mxu1 (!%p391_p9), %v1551_v33  ;;  %v677_v38 = vsub.s32 (!%p391_p9), 0, %v1690_v9  ;;  %vm693_vm7 = vcmask (!%p391_p9), 130048  }
  0x18   : > { %v1778_v46 = vpack.c.bf16 (!%p391_p9), %v448_v43, %v447_v42  ;;  %v1781_v47 = vpack.c.bf16 (!%p391_p9), %v466_v45, %v465_v44  ;;  %v449_v48 = vld [vmem:[%s2021_s12 + $0x40] sm:$0xff] (!%p391_p9)  ;;  %v450_v49 = vld [vmem:[%s2021_s12 + $0x48] sm:$0xff] (!%p391_p9)  ;;  %v467_v50 = vld [vmem:[%s2021_s12 + $0xd0] sm:$0xff] (!%p391_p9)  ;;  %1333 = vmatprep.mubr.msk.bf16.mxu1 (!%p391_p9), %vm1552_vm3, %v1551_v33  ;;  %vm708_vm8 = vcmask (!%p391_p9), 121856   ;;  %vm786_vm9 = vcmask (!%p391_p9), 916480  }
  0x19   : > { %s435_s20 = scalar_select %p434_p10, %s1651_s29, 1  ;;  %v468_v51 = vld [vmem:[%s2021_s12 + $0xd8] sm:$0xff]  ;;  %v1796_v52 = vpack.c.bf16 %v450_v49, %v449_v48  ;;  %v451_v54 = vld [vmem:[%s2021_s12 + $0x50] sm:$0xff]  ;;  %v469_v56 = vld [vmem:[%s2021_s12 + $0xe0] sm:$0xff]  ;;  %vm801_vm10 = vcmask 908288   ;;  %vm754_vm11 = vcmask 1039360  }
  0x1a   : > { %1354 = vmatpush3.bf16.msra.mxu0 %v1742_v34  ;;  %v1799_v53 = vpack.c.bf16 %v468_v51, %v467_v50  ;;  %v452_v55 = vld [vmem:[%s2021_s12 + $0x58] sm:$0xff]  ;;  %v470_v57 = vld [vmem:[%s2021_s12 + $0xe8] sm:$0xff]  ;;  %v453_v60 = vld [vmem:[%s2021_s12 + $0x60] sm:$0xff]  ;;  %vm773_vm12 = vcmask 924672   ;;  %vm833_vm13 = vcmask 293888   ;;  %vm988_vm14 = vcmask 519168  }
  0x1b   : > { %s1254_s21 = sshll.u32 %s435_s20, 3  ;;  %1356 = vmatprep.subr.bf16.mxu0 %v1745_v35  ;;  %v1814_v58 = vpack.c.bf16 %v452_v55, %v451_v54  ;;  %v1817_v59 = vpack.c.bf16 %v470_v57, %v469_v56  ;;  %v454_v61 = vld [vmem:[%s2021_s12 + $0x68] sm:$0xff]  ;;  %v471_v62 = vld [vmem:[%s2021_s12 + $0xf0] sm:$0xff]  ;;  %v472_v63 = vld [vmem:[%s2021_s12 + $0xf8] sm:$0xff]  ;;  %s1548_s20 = smov 112  }
  0x1c   : > { %s438_s24 = scalar_lea.vmem %s2028_s0, %s1254_s21  ;;  %s1543_s0 = smov 17   ;;  %v546_v36 = vld [vmem:[%s2018_s9] sm:$0xf] }
  0x1d   : > { %v1683_v0 = vld [vmem:[%s438_s24] sm:$0xff]  ;;  %s1549_s21 = smov 113   ;;  %s1556_s24 = smov 8  }
  0x1e   : > { %v474_v1 = vcombine.high %v1683_v0, %v1683_v0  ;;  %v599_v2 = vsel %vm598_vm0, %v1683_v0, 0.0  ;;  %1358 = vmatpush3.bf16.msra.mxu0 %v1760_v40  ;;  %v827_v37 = vld [vmem:[%s2015_s6] sm:$0xf] }
  0x1f   : > { %1360 = vmatprep.subr.bf16.mxu0 %v1763_v41  ;;  %v660_v39 = vld [vmem:[%s2019_s10] ss:$2 sm:$0x3]  ;;  %v1244_v50 = vld [vmem:[%s2019_s10 + $0x1] ss:$2 sm:$0x3] }
  0x20   : > { %v600_v3 = vsel %vm598_vm0, %v474_v1, 0.0  ;;  %540 = vmatprep.mubr.f32.mxu0 %v474_v1  ;;  %v1832_v1 = vpack.c.bf16 %v454_v61, %v453_v60  ;;  %v1879_v42 = vrot.slane %v660_v39, %v677_v38  ;;  %v1889_v60 = vrot.slane %v1244_v50, %v677_v38 }
  0x21   : > { %v601_v4 = vadd.f32 %v600_v3, %v599_v2  ;;  %v1835_v2 = vpack.c.bf16 %v472_v63, %v471_v62  ;;  %v455_v3 = vld [vmem:[%s2021_s12 + $0x70] sm:$0xff]  ;;  %v681_v61 = vsub.s32 1, %v1690_v9 }
  0x22   : > { %1362 = vmatpush3.bf16.msra.mxu0 %v1778_v46 }
  0x23   : > { %602 = vadd.xlane.f32.xlu0 %v601_v4  ;;  %1364 = vmatprep.subr.bf16.mxu0 %v1781_v47  ;;  %v456_v4 = vld [vmem:[%s2021_s12 + $0x78] sm:$0xff] }
  0x24   : > { %v1844_v5 = vpack.c.bf16 %v456_v4, %v455_v3 }
  0x26   : > { %1366 = vmatpush3.bf16.msra.mxu0 %v1796_v52 }
  0x27   : > { %1368 = vmatprep.subr.bf16.mxu0 %v1799_v53 }
  0x2a   : > { %1370 = vmatpush3.bf16.msra.mxu0 %v1814_v58 }
  0x2b   : > { %1372 = vmatprep.subr.bf16.mxu0 %v1817_v59 }
  0x2e   : > { %1374 = vmatpush3.bf16.msra.mxu0 %v1832_v1 }
  0x2f   : > { %1376 = vmatprep.subr.bf16.mxu0 %v1835_v2 }
  0x32   : > { %1378 = vmatpush3.bf16.msra.mxu0 %v1844_v5 }
  0x33   : > { %1337 = vmatprep.subr.bf16.mxu0 %v1551_v33 }
  0x35   : > { %541 = vmatmul.mubr.f32.vlgmr.msra.gmra.mrb[0].mxu0 %v1683_v0 }
  0x36   : > { %1343 = vmatprep.mubr.msk.bf16.mxu0 %vm1552_vm3, %v1551_v33  ;;  %vm1026_vm3 = vcmask 72704  }
  0xb0   : > { %v603_v11 = vpop.xlane.xlu0 %602 }
  0xb1   : > { %v1695_v12 = vmul.f32 0.00390625, %v603_v11  ;;  %v596_v11 = vld [vmem:[%s2029_s1] sm:$0xf] }
  0xb3   : > { %v613_v13 = vrot.slane %v1695_v12, %v1693_v10 }
  0xb5   : > { %v615_v14 = vsub.f32 %v1683_v0, %v613_v13 }
  0xb7   : > { %v616_v15 = vmul.f32 %v615_v14, %v615_v14 }
  0xb9   : > { %v618_v16 = vcombine.high %v616_v15, %v616_v15  ;;  %v620_v17 = vsel %vm598_vm0, %v616_v15, 0.0  ;;  %v597_v15 = vld [vmem:[%s2011_s2] sm:$0xf] }
  0xbb   : > { %v621_v18 = vsel %vm598_vm0, %v618_v16, 0.0  ;;  %vm1078_vm0 = vcmask 465920  }
  0xbc   : > { %v622_v19 = vadd.f32 %v621_v18, %v620_v17 }
  0xbe   : > { %623 = vadd.xlane.f32.xlu0 %v622_v19 }
 0x14b   : > { %v624_v6 = vpop.xlane.xlu0 %623 }
 0x14c   : > { %v625_v7 = vmul.f32 0.00390625, %v624_v6  ;;  %v721_v6 = vrot.slane %v1244_v50, %v681_v61 }
 0x14e   : > { %v626_v8 = vadd.f32 1e-05, %v625_v7 }
 0x150   : > { %1473 = vrsqrt.f32 %v626_v8 }
 0x15a   : > { %v1474_v13 = vpop.eup %1473 }
 0x15b   : > { %v628_v14 = vmul.f32 %v1474_v13, %v596_v11 }
 0x15d   : > { %631 = vperm.xlu1 %1470, %v628_v14   ;;  %v642_v16 = vmul.f32 %v628_v14, %v1695_v12  ;;  %v682_v14 = vrot.slane %v660_v39, %v681_v61 }
 0x15f   : > { %v643_v17 = vsub.f32 %v597_v15, %v642_v16 }
 0x161   : > { %646 = vperm.xlu1 %1470, %v643_v17  }
 0x1dc   : > { %v632_v18 = vpop.permute.xlu1 %631 }
 0x1dd   : > { %v639_v19 = vrot.slane %v632_v18, %v1693_v10 }
 0x1df   : > { %v641_v22 = vmul.f32 %v639_v19, %v1683_v0  ;;  %v1287_v0 = vpop.f32.mrb[0].mxu0 }
 0x1e0   : > { %v647_v21 = vpop.permute.xlu1 %646 }
 0x1e1   : > { %v654_v23 = vrot.slane %v647_v21, %v1693_v10  ;;  %v1288_v10 = vpop.f32.mrb[1].mxu0 }
 0x1e2   : > { %v1289_v12 = vadd.f32 %v1288_v10, %v1287_v0 }
 0x1e3   : > { %v656_v25 = vadd.f32 %v654_v23, %v641_v22 }
 0x1e4   : > { %v547_v31 = vpack.c.bf16 %v1289_v12, %v1289_v12 }
 0x1e5   : > { %vm657_vm1 = vcmp.ge.f32.partialorder %v656_v25, 0.0  ;;  %v658_v26 = vmul.f32 0.2, %v656_v25 }
 0x1e6   : > { %v554_v32 = vsel %vm552_vm2, %v547_v31, 0 }
 0x1e7   : > { %v659_v27 = vsel %vm657_vm1, %v656_v25, %v658_v26  ;;  %1332 = vmatpush3.bf16.msra.mxu1 %v554_v32  ;;  %vm1094_vm1 = vcmask 449536  }
 0x1e8   : > { %v664_v30 = vcombine.high %v659_v27, %v659_v27  ;;  %748 = vst [vmem:[#allocation2 + $0x20] sm:$0xf] %v659_v27  ;;  %665 = vrot.lane.b32.xlu1 %v659_v27, %s1543_s0  ;;  %728 = vrot.lane.b32.xlu0 %v659_v27, %s1544_s17 }
 0x1ea   : > { %749 = vst [vmem:[#allocation2 + $0x28] sm:$0xf] %v664_v30  ;;  %1334 = vmatmul.mubr.msk.bf16.vlgmr.msra.gmra.mrb[0].mxu1 %vm548_vm4, %v546_v36  ;;  %vm1042_vm4 = vcmask 523268  }
 0x1eb   : > { %875 = vmatprep.mubr.bf16.mxu1 %v1542_v20 }
 0x1ec   : > { %689 = vrot.lane.b32.xlu1 %v659_v27, %s1545_s30  ;;  %750 = vrot.lane.b32.xlu0 %v659_v27, %s1546_s15 }
 0x1f0   : > { %704 = vrot.lane.b32.xlu1 %v659_v27, %s1547_s16  ;;  %782 = vrot.lane.b32.xlu0 %v659_v27, %s1548_s20 }
 0x1f4   : > { %769 = vrot.lane.b32.xlu1 %v659_v27, %s1549_s21  ;;  %706 = vrot.lane.b32.xlu0 %v664_v30, %s1547_s16  ;;  %s1558_s16 = smov 120  }
 0x1f8   : > { %784 = vrot.lane.b32.xlu0 %v664_v30, %s1548_s20  ;;  %730 = vrot.lane.b32.xlu1 %v664_v30, %s1544_s17 }
 0x1fc   : > { %799 = vrot.lane.b32.xlu0 %v664_v30, %s1550_s22  ;;  %667 = vrot.lane.b32.xlu1 %v664_v30, %s1543_s0  ;;  %s1557_s0 = smov 7  }
 0x200   : > { %691 = vrot.lane.b32.xlu1 %v664_v30, %s1545_s30  ;;  %s1251_s30 = sshll.u32 %s1651_s29, 7 }
 0x204   : > { %752 = vrot.lane.b32.xlu1 %v664_v30, %s1546_s15 }
 0x208   : > { %771 = vrot.lane.b32.xlu1 %v664_v30, %s1549_s21  ;;  %s1553_s21 = smov 121  }
 0x20c   : > { %797 = vrot.lane.b32.xlu1 %v659_v27, %s1550_s22  ;;  %s1554_s22 = smov 119  }
 0x210   : > { %830 = vperm.xlu1 %1470, %v827_v37  }
 0x25a   : > { %v666_v20 = vpop.permute.xlu1 %665  ;;  %v729_v43 = vpop.permute.xlu0 %728 }
 0x25b   : > { %v673_v44 = vsel %vm669_vm5, 0.0, %v666_v20  ;;  %v736_v45 = vsel %vm732_vm6, 0.0, %v729_v43 }
 0x25c   : > { %v685_v48 = vmul.f32 %v1879_v42, %v673_v44  ;;  %v737_v49 = vmul.f32 %v736_v45, %v1879_v42 }
 0x25e   : > { %687 = vst [vmem:[#allocation2] sm:$0xf] %v685_v48  ;;  %v741_v51 = vrot.slane %v737_v49, 4  ;;  %v690_v54 = vpop.permute.xlu1 %689  ;;  %v751_v55 = vpop.permute.xlu0 %750 }
 0x25f   : > { %v696_v56 = vsel %vm693_vm7, 0.0, %v690_v54 }
 0x260   : > { %745 = vst [vmem:[#allocation2 + $0x10] sm:$0xf0] %v741_v51  ;;  %v698_v57 = vrot.slane %v696_v56, 4 }
 0x262   : > { %702 = vst [vmem:[#allocation2] sm:$0xf0] %v698_v57  ;;  %v705_v62 = vpop.permute.xlu1 %704  ;;  %v783_v63 = vpop.permute.xlu0 %782 }
 0x263   : > { %v712_v3 = vsel %vm708_vm8, 0.0, %v705_v62 }
 0x264   : > { %v724_v4 = vmul.f32 %v1889_v60, %v712_v3 }
 0x266   : > { %726 = vst [vmem:[#allocation2 + $0x10] sm:$0xf] %v724_v4  ;;  %v770_v7 = vpop.permute.xlu1 %769  ;;  %v707_v8 = vpop.permute.xlu0 %706 }
 0x267   : > { %v709_v11 = vsel %vm708_vm8, %v705_v62, %v707_v8  ;;  %vm1085_vm8 = vcmask 457728  }
 0x268   : > { %v725_v13 = vmul.f32 %v721_v6, %v709_v11 }
 0x269   : > { %v810_v62 = vld [vmem:[#allocation2] sm:$0xff] }
 0x26a   : > { %727 = vst [vmem:[#allocation2 + $0x18] sm:$0xf] %v725_v13  ;;  %v785_v15 = vpop.permute.xlu0 %784  ;;  %v731_v16 = vpop.permute.xlu1 %730 }
 0x26b   : > { %v787_v17 = vsel %vm786_vm9, %v783_v63, %v785_v15  ;;  %v789_v18 = vsel %vm786_vm9, %v785_v15, 0.0  ;;  %v733_v9 = vsel %vm732_vm6, %v729_v43, %v731_v16 }
 0x26c   : > { %v791_v19 = vrot.slane %v787_v17, 4  ;;  %v792_v21 = vrot.slane %v789_v18, 4  ;;  %v738_v22 = vmul.f32 %v733_v9, %v682_v14 }
 0x26e   : > { %795 = vst [vmem:[#allocation2 + $0x30] sm:$0xf0] %v791_v19  ;;  %796 = vst [vmem:[#allocation2 + $0x38] sm:$0xf0] %v792_v21  ;;  %v742_v23 = vrot.slane %v738_v22, 4  ;;  %v800_v25 = vpop.permute.xlu0 %799  ;;  %v668_v26 = vpop.permute.xlu1 %667 }
 0x26f   : > { %v805_v27 = vsel %vm801_vm10, %v800_v25, 0.0  ;;  %v670_v30 = vsel %vm669_vm5, %v666_v20, %v668_v26  ;;  %vm1037_vm5 = vcmask 64512  }
 0x270   : > { %746 = vst [vmem:[#allocation2 + $0x18] sm:$0xf0] %v742_v23  ;;  %v807_v0 = vmul.f32 %v805_v27, %v721_v6  ;;  %v686_v10 = vmul.f32 %v682_v14, %v670_v30  ;;  %v986_v27 = vld [vmem:[%s2012_s3] sm:$0xf] }
 0x272   : > { %809 = vst [vmem:[#allocation2 + $0x48] sm:$0xf] %v807_v0  ;;  %688 = vst [vmem:[#allocation2 + $0x8] sm:$0xf] %v686_v10  ;;  %v692_v12 = vpop.permute.xlu1 %691  ;;  %v987_v10 = vld [vmem:[%s2013_s4] sm:$0xf] }
 0x273   : > { %v694_v31 = vsel %vm693_vm7, %v690_v54, %v692_v12  ;;  %v812_v54 = vld [vmem:[#allocation2 + $0x10] sm:$0xff]  ;;  %vm1068_vm7 = vcmask 515072  }
 0x274   : > { %v699_v32 = vrot.slane %v694_v31, 4  ;;  %v820_v3 = vpack.c.bf16 %v812_v54, %v810_v62 }
 0x276   : > { %703 = vst [vmem:[#allocation2 + $0x8] sm:$0xf0] %v699_v32  ;;  %v753_v36 = vpop.permute.xlu1 %752 }
 0x277   : > { %v755_v37 = vsel %vm754_vm11, %v751_v55, %v753_v36  ;;  %v758_v38 = vsel %vm754_vm11, %v753_v36, 0.0  ;;  %v813_v57 = vld [vmem:[#allocation2 + $0x18] sm:$0xff] }
 0x278   : > { %v759_v39 = vmul.f32 %v755_v37, %v1889_v60  ;;  %v760_v43 = vmul.f32 %v758_v38, %v721_v6 }
 0x27a   : > { %v763_v44 = vrot.slane %v759_v39, 4  ;;  %v764_v20 = vrot.slane %v760_v43, 4  ;;  %v772_v45 = vpop.permute.xlu1 %771 }
 0x27b   : > { %v774_v48 = vsel %vm773_vm12, %v770_v7, %v772_v45  ;;  %v777_v49 = vsel %vm773_vm12, %v772_v45, 0.0  ;;  %v819_v7 = vld [vmem:[#allocation2 + $0x48] sm:$0xf] }
 0x27c   : > { %767 = vst [vmem:[#allocation2 + $0x20] sm:$0xf0] %v763_v44  ;;  %768 = vst [vmem:[#allocation2 + $0x28] sm:$0xf0] %v764_v20  ;;  %v778_v50 = vmul.f32 %v774_v48, %v1879_v42  ;;  %v779_v51 = vmul.f32 %v777_v49, %v682_v14  ;;  %v825_v15 = vpack.c.bf16 %v819_v7, %v819_v7  ;;  %v1107_v44 = vld [vmem:[%s2017_s8] sm:$0xff] }
 0x27d   : > { %v811_v56 = vld [vmem:[#allocation2 + $0x8] sm:$0xff]  ;;  %v1247_v20 = vld [vmem:[%s2020_s11] ss:$0 sm:$0xff] }
 0x27e   : > { %780 = vst [vmem:[#allocation2 + $0x30] sm:$0xf] %v778_v50  ;;  %781 = vst [vmem:[#allocation2 + $0x38] sm:$0xf] %v779_v51  ;;  %v798_v55 = vpop.permute.xlu1 %797  ;;  %v821_v61 = vpack.c.bf16 %v813_v57, %v811_v56  ;;  %v1248_v56 = vld [vmem:[%s2020_s11 + $0x1] ss:$0 sm:$0xff] }
 0x27f   : > { %v802_v63 = vsel %vm801_vm10, %v798_v55, %v800_v25 }
 0x280   : > { %v806_v4 = vmul.f32 %v802_v63, %v1889_v60  ;;  %843 = vmatprep.subr.bf16.mxu1 %v821_v61  ;;  %v826_v60 = vld [vmem:[%s2014_s5] sm:$0x3] }
 0x281   : > { %844 = vmatpush1.bf16.msra.mxu1 %v820_v3 }
 0x282   : > { %808 = vst [vmem:[#allocation2 + $0x40] sm:$0xf] %v806_v4 }
 0x283   : > { %v815_v6 = vld [vmem:[#allocation2 + $0x28] sm:$0xff]  ;;  %v814_v8 = vld [vmem:[#allocation2 + $0x20] sm:$0xff] }
 0x285   : > { %v817_v42 = vld [vmem:[#allocation2 + $0x38] sm:$0xff]  ;;  %v816_v11 = vld [vmem:[#allocation2 + $0x30] sm:$0xff] }
 0x286   : > { %v823_v13 = vpack.c.bf16 %v817_v42, %v815_v6  ;;  %v822_v14 = vpack.c.bf16 %v816_v11, %v814_v8 }
 0x288   : > { %845 = vmatprep.subr.bf16.mxu1 %v823_v13 }
 0x289   : > { %846 = vmatpush1.bf16.msra.mxu1 %v822_v14  ;;  %v818_v16 = vld [vmem:[#allocation2 + $0x40] sm:$0xf] }
 0x28a   : > { %1245 = vmatprep.subr.msk.bf16.mxu1 %vm552_vm2, %v825_v15  ;;  %v824_v17 = vpack.c.bf16 %v818_v16, %v818_v16 }
 0x28c   : > { %v838_v18 = vsel %vm552_vm2, %v824_v17, 0 }
 0x28d   : > { %848 = vmatpush1.bf16.msra.mxu1 %v838_v18 }
 0x28e   : > { %1380 = vmatprep.subr.bf16.mxu1 %v1713_v24 }
 0x290   : > { %1246 = vmatmul.mubr.msk.bf16.vlgmr.msra.gmra.mrb[4].mxu1 %vm833_vm13, %v826_v60 }
 0x291   : > { %1382 = vmatpush3.bf16.msra.mxu1 %v1724_v28 }
 0x292   : > { %1384 = vmatprep.subr.bf16.mxu1 %v1726_v29 }
 0x295   : > { %1386 = vmatpush3.bf16.msra.mxu1 %v1742_v34 }
 0x296   : > { %1388 = vmatprep.subr.bf16.mxu1 %v1745_v35 }
 0x299   : > { %1390 = vmatpush3.bf16.msra.mxu1 %v1760_v40  ;;  %v831_v40 = vpop.permute.xlu1 %830 }
 0x29a   : > { %1392 = vmatprep.subr.bf16.mxu1 %v1763_v41 }
 0x29d   : > { %1394 = vmatpush3.bf16.msra.mxu1 %v1778_v46 }
 0x29e   : > { %1396 = vmatprep.subr.bf16.mxu1 %v1781_v47 }
 0x2a1   : > { %1398 = vmatpush3.bf16.msra.mxu1 %v1796_v52 }
 0x2a2   : > { %1400 = vmatprep.subr.bf16.mxu1 %v1799_v53 }
 0x2a5   : > { %1402 = vmatpush3.bf16.msra.mxu1 %v1814_v58 }
 0x2a6   : > { %1404 = vmatprep.subr.bf16.mxu1 %v1817_v59 }
 0x2a9   : > { %1406 = vmatpush3.bf16.msra.mxu1 %v1832_v1 }
 0x2aa   : > { %1408 = vmatprep.subr.bf16.mxu1 %v1835_v2 }
 0x2ad   : > { %1410 = vmatpush3.bf16.msra.mxu1 %v1844_v5 }
 0x2bd   : > { %v1923_v24 = vpop.f32.mrb[0].mxu1 }
 0x2be   : > { %v1335_v28 = vpop.f32.mrb[1].mxu1 }
 0x2bf   : > { %v593_v29 = vpop.f32.mrb[2].mxu1 }
 0x2c0   : > { %v1336_v34 = vpop.f32.mrb[3].mxu1 }
 0x363   : > { %v877_v35 = vpop.f32.mrb[4].mxu1 }
 0x364   : > { %v879_v41 = vpop.f32.mrb[5].mxu1  ;;  %v878_v52 = vadd.f32 %v877_v35, %v831_v40 }
 0x365   : > { %v880_v46 = vadd.f32 %v879_v41, %v831_v40  ;;  %v881_v47 = vpop.f32.mrb[6].mxu1 }
 0x366   : > { %v882_v53 = vpop.f32.mrb[7].mxu1 }
 0x367   : > { %980 = vmatprep.mubr.f32.mxu1 %v880_v46 }
 0x368   : > { %981 = vmatmul.mubr.f32.vlgmr.msra.gmra.mrb[8].mxu1 %v878_v52 }
 0x43b   : > { %v1324_v58 = vpop.f32.mrb[8].mxu1 }
 0x43c   : > { %v1325_v59 = vpop.f32.mrb[9].mxu1 }
 0x43d   : > { %v1326_v1 = vadd.f32 %v1325_v59, %v1324_v58  ;;  %v1106_v58 = vld [vmem:[%s2016_s7] sm:$0xf] }
 0x43f   : > { %v989_v2 = vsel %vm988_vm14, %v1326_v1, 0.0 }
 0x440   : > { %990 = vadd.xlane.f32.xlu0 %v989_v2 }
 0x4cd   : > { %v991_v5 = vpop.xlane.xlu0 %990 }
 0x4ce   : > { %v993_v9 = vmul.f32 0.015625, %v991_v5 }
 0x4d0   : > { %v994_v19 = vsub.f32 %v1326_v1, %v993_v9 }
 0x4d2   : > { %v995_v21 = vmul.f32 %v994_v19, %v994_v19 }
 0x4d4   : > { %v996_v22 = vsel %vm988_vm14, %v995_v21, 0.0 }
 0x4d5   : > { %997 = vadd.xlane.f32.xlu1 %v996_v22 }
 0x562   : > { %v998_v23 = vpop.xlane.xlu1 %997 }
 0x563   : > { %v999_v25 = vmul.f32 0.015625, %v998_v23 }
 0x565   : > { %v1000_v26 = vadd.f32 1e-05, %v999_v25 }
 0x567   : > { %1475 = vrsqrt.f32 %v1000_v26 }
 0x571   : > { %v1476_v30 = vpop.eup %1475 }
 0x572   : > { %v1002_v0 = vmul.f32 %v1476_v30, %v986_v27 }
 0x574   : > { %1005 = vperm.xlu0 %1471, %v1002_v0   ;;  %v1009_v12 = vmul.f32 %v1002_v0, %v993_v9 }
 0x576   : > { %v1010_v31 = vsub.f32 %v987_v10, %v1009_v12 }
 0x578   : > { %1013 = vperm.xlu1 %1470, %v1010_v31  }
 0x5f3   : > { %v1006_v32 = vpop.permute.xlu0 %1005 }
 0x5f4   : > { %v1008_v36 = vmul.f32 %v1326_v1, %v1006_v32 }
 0x5f7   : > { %v1014_v37 = vpop.permute.xlu1 %1013 }
 0x5f8   : > { %v1016_v38 = vadd.f32 %v1014_v37, %v1008_v36 }
 0x5fa   : > { %vm1017_vm15 = vcmp.ge.f32.partialorder %v1016_v38, 0.0  ;;  %v1018_v39 = vmul.f32 0.2, %v1016_v38 }
 0x5fc   : > { %v1019_v43 = vsel %vm1017_vm15, %v1016_v38, %v1018_v39 }
 0x5fd   : > { %1064 = vst.msk [vmem:[#allocation2 + $0x20] sm:$0xf] %vm988_vm14, %v1019_v43  ;;  %1075 = vrot.lane.b32.xlu0 %v1019_v43, %s1553_s21  ;;  %1055 = vrot.lane.b32.xlu1 %v1019_v43, %s1544_s17 }
 0x601   : > { %1091 = vrot.lane.b32.xlu0 %v1019_v43, %s1554_s22  ;;  %1023 = vrot.lane.b32.xlu1 %v1019_v43, %s1555_s23  ;;  %s1967_s22 = scalar_lea.hbm %s2022_s13, %s1251_s30 }
 0x605   : > { %1034 = vrot.lane.b32.xlu1 %v1019_v43, %s1556_s24  ;;  %s1559_s24 = smov [#allocation3]  }
 0x609   : > { %1044 = vrot.lane.b32.xlu1 %v1019_v43, %s1557_s0  ;;  %s431_s0 = sand.u32 1, %s1531_s26  }
 0x60a   : > { %s1164_s29 = scalar_lea.sflag [#allocation4], %s431_s0 }
 0x60d   : > { %1065 = vrot.lane.b32.xlu1 %v1019_v43, %s1546_s15 }
 0x611   : > { %1082 = vrot.lane.b32.xlu1 %v1019_v43, %s1558_s16  ;;  %s1240_s16 = sshll.u32 %s431_s0, 3 }
 0x612   : > { %s433_s20 = scalar_lea.vmem [#allocation3], %s1240_s16  ;;  %s1481_s16 = sshll.u32 %s1559_s24, 4  ;;  %s1482_s16 = int_to_ptr.vmem [resolvable:$false] %s1481_s16 }
 0x613   : > { %s1177_s21 = sshll.u32 %s433_s20, 4  ;;  %s1483_s1 = scalar_lea.vmem %s1482_s16, 256  ;;  %s1969_s21 = int_to_ptr.vmem [resolvable:$true] %s1177_s21 }
 0x614   : > { %s1477_s23 = scalar_lea.vmem %s1969_s21, 128  ;;  %p1484_p0 = scmp.lt.s32.totalorder %s1969_s21, %s1482_s16 }
 0x615   : > { %1110 = vperm.xlu1 %1470, %v1107_v44   ;;  %p1478_p11 = scmp.ne.s32.totalorder %s1969_s21, %s1477_s23  ;;  %p1485_p1 = scmp.lt.s32.totalorder %s1483_s1, %s1477_s23 }
 0x617   : > { %p1479_p12 = pnand %p1478_p11, %p1668_p5  ;;  %p1486_p2 = por %p1485_p1, %p1484_p0 }
 0x619   : > { %p1480_p13 = pneg %p1479_p12 }
 0x61b   : > { %p1487_p3 = pnand %p1486_p2, %p1480_p13 }
 0x66f   : > { %v1076_v45 = vpop.permute.xlu0 %1075  ;;  %v1056_v48 = vpop.permute.xlu1 %1055 }
 0x670   : > { %v1079_v49 = vsel %vm1078_vm0, %v1076_v45, 0.0  ;;  %v1058_v50 = vsel %vm732_vm6, 0.0, %v1056_v48  ;;  %vm1047_vm6 = vcmask 56320  }
 0x671   : > { %v1080_v51 = vmul.f32 %v1247_v20, %v1079_v49  ;;  %v1059_v54 = vmul.f32 %v1247_v20, %v1058_v50 }
 0x673   : > { %1081 = vst.msk [vmem:[#allocation2 + $0x30] sm:$0xf] %vm988_vm14, %v1080_v51  ;;  %v1061_v57 = vrot.slane %v1059_v54, 4  ;;  %v1092_v55 = vpop.permute.xlu0 %1091  ;;  %v1024_v61 = vpop.permute.xlu1 %1023 }
 0x674   : > { %v1095_v62 = vsel %vm1094_vm1, %v1092_v55, 0.0  ;;  %v1027_v63 = vsel %vm1026_vm3, 0.0, %v1024_v61 }
 0x675   : > { %1063 = vst.msk [vmem:[#allocation2 + $0x10] sm:$0xf0] %vm1042_vm4, %v1061_v57  ;;  %v1096_v3 = vmul.f32 %v1248_v56, %v1095_v62  ;;  %v1032_v4 = vmul.f32 %v1247_v20, %v1027_v63 }
 0x677   : > { %1097 = vst.msk [vmem:[#allocation2 + $0x40] sm:$0xf] %vm988_vm14, %v1096_v3  ;;  %1033 = vst.msk [vmem:[#allocation2] sm:$0xf] %vm988_vm14, %v1032_v4  ;;  %v1035_v6 = vpop.permute.xlu1 %1034 }
 0x678   : > { %v1038_v7 = vsel %vm1037_vm5, 0.0, %v1035_v6 }
 0x679   : > { %v1040_v42 = vrot.slane %v1038_v7, 4 }
 0x67b   : > { %1043 = vst.msk [vmem:[#allocation2] sm:$0xf0] %vm1042_vm4, %v1040_v42  ;;  %v1045_v8 = vpop.permute.xlu1 %1044 }
 0x67c   : > { %v1048_v11 = vsel %vm1047_vm6, 0.0, %v1045_v8 }
 0x67d   : > { %v1053_v13 = vmul.f32 %v1248_v56, %v1048_v11 }
 0x67e   : > { %v1102_v40 = vld [vmem:[#allocation2 + $0x40] sm:$0xf] }
 0x67f   : > { %1054 = vst.msk [vmem:[#allocation2 + $0x10] sm:$0xf] %vm988_vm14, %v1053_v13  ;;  %v1066_v14 = vpop.permute.xlu1 %1065  ;;  %v1105_v52 = vpack.c.bf16 %v1102_v40, %v1102_v40 }
 0x680   : > { %v1069_v15 = vsel %vm1068_vm7, %v1066_v14, 0.0 }
 0x681   : > { %v1070_v16 = vmul.f32 %v1248_v56, %v1069_v15  ;;  %v1117_v53 = vsel %vm552_vm2, %v1105_v52, 0  ;;  %vm1161_vm2 = vcmask 523264  }
 0x682   : > { %v1098_v29 = vld [vmem:[#allocation2] sm:$0xff] }
 0x683   : > { %v1072_v17 = vrot.slane %v1070_v16, 4  ;;  %v1083_v18 = vpop.permute.xlu1 %1082 }
 0x684   : > { %v1086_v60 = vsel %vm1085_vm8, %v1083_v18, 0.0 }
 0x685   : > { %1074 = vst.msk [vmem:[#allocation2 + $0x20] sm:$0xf0] %vm1042_vm4, %v1072_v17  ;;  %v1088_v28 = vrot.slane %v1086_v60, 4 }
 0x686   : > { %v1099_v34 = vld [vmem:[#allocation2 + $0x10] sm:$0xff] }
 0x687   : > { %1090 = vst.msk [vmem:[#allocation2 + $0x30] sm:$0xf0] %vm1042_vm4, %v1088_v28  ;;  %v1103_v35 = vpack.c.bf16 %v1099_v34, %v1098_v29 }
 0x689   : > { %1338 = vmatpush3.bf16.msra.mxu0 %v1103_v35 }
 0x68a   : > { %1339 = vmatprep.subr.bf16.mxu0 %v1551_v33 }
 0x68c   : > { %v1100_v41 = vld [vmem:[#allocation2 + $0x20] sm:$0xff] }
 0x68e   : > { %v1101_v46 = vld [vmem:[#allocation2 + $0x30] sm:$0xff] }
 0x68f   : > { %v1104_v47 = vpack.c.bf16 %v1101_v46, %v1100_v41 }
 0x691   : > { %1340 = vmatpush3.bf16.msra.mxu0 %v1104_v47 }
 0x692   : > { %1341 = vmatprep.subr.bf16.mxu0 %v1551_v33 }
 0x694   : > { %v1111_v59 = vpop.permute.xlu1 %1110 }
 0x695   : > { %1342 = vmatpush3.bf16.msra.mxu0 %v1117_v53  ;;  %v1411_v1 = vadd.f32 %v1111_v59, %v1923_v24 }
 0x698   : > { %1344 = vmatmul.mubr.msk.bf16.vlgmr.msra.gmra.mrb[4].mxu0 %vm833_vm13, %v1106_v58 }
 0x76b   : > { %v1153_v2 = vpop.f32.mrb[4].mxu0 }
 0x76c   : > { %v1412_v33 = vadd.f32 %v1411_v1, %v1153_v2  ;;  %v1345_v5 = vpop.f32.mrb[5].mxu0 }
 0x76d   : > { %v1156_v9 = vpop.f32.mrb[6].mxu0 }
 0x76e   : > { %v1160_v19 = vmul.f32 0.70710677, %v1412_v33  ;;  %v1346_v21 = vpop.f32.mrb[7].mxu0 }
 0x770   : > { %1162 = vst.msk [vmem:[%s433_s20] sm:$0xff] %vm1161_vm2, %v1160_v19 }
 0x771   : > { %1490 = shalt.err (!%p1487_p3)
}
 0x772   : > { %s1491_s0 = scalar_lea.hbm %s1967_s22, 128  ;;  %s1495_s17 = scalar_lea.hbm %s2022_s13, 256 }
 0x773   : > { %p1492_p4 = scmp.ne.s32.totalorder %s1967_s22, %s1491_s0  ;;  %p1496_p9 = scmp.lt.u32.totalorder %s1967_s22, %s2022_s13 }
 0x774   : > { %p1497_p10 = scmp.lt.u32.totalorder %s1495_s17, %s1491_s0  ;;  %p1499_p12 = scmp.lt.u32.totalorder %s1491_s0, %s1967_s22 }
 0x775   : > { %p1493_p7 = pnand %p1492_p4, %p1668_p5 }
 0x776   : > { %p1498_p11 = por %p1497_p10, %p1496_p9 }
 0x777   : > { %p1494_p8 = pneg %p1493_p7 }
 0x778   : > { %p1500_p13 = por %p1499_p12, %p1498_p11 }
 0x77a   : > { %p1501_p0 = pnand %p1500_p13, %p1494_p8 }
 0x77c   : > { %1504 = shalt.err (!%p1501_p0)
}
 0x77d   : > { %1413 = dma.vmem_to_hbm [thread:$0]  (%p1668_p5), %s1969_s21, 128, %s1967_s22, %s1164_s29  }
 0x77e PF: > { %p1419_p1 = scmp.ge.s32.totalorder %s1539_s28, 2  ;;  %s1189_s1 = sand.u32 1, %s1527_s25  }
 0x77f   : > { %s1190_s23 = scalar_lea.sflag [#allocation4], %s1189_s1 }
 0x780   : > { %p1416_p2 = pnand %p1419_p1, %p1672_p6 }
 0x782   : > { %1522 = dma.done.wait (!%p1416_p2), %s1190_s23, 128  }
 0x783   : > { %1524 = vsyncadd (!%p1416_p2), %s1190_s23, 4294967168  ;;  %s2030_s16 = sld [smem:[#allocation6_spill]]  ;;  %p23_p3 = scmp.ge.s32.totalorder %s1655_s14, 4  }
 0x784   : > { %s2031_s25 = smov %s1531_s26  ;;  %s2032_s26 = smov %s1535_s27 }
 0x785   : > { %s2034_s28 = smov %s1655_s14  ;;  %25 = sbr.rel (!%p23_p3) target bundleno = 6 (0x6), region = 108 }
 0x789   : > { %s2033_s27 = smov %s2030_s16 }
 0x78c   :  { %1195 = vsyncpa [#allocation4], 1 }
 0x78d   :  { %1197 = vsyncpa [#allocation4 + $0x1], 1 }

</bundles_post_ra>
